<compile_context>
chip_gen: v7x
topology: tpu7x:2x2x1
jax: 0.10.0
libtpu: 0.0.40
codegen_flags: <defaults>
</compile_context>

<pallas_src>
import functools

import jax
import jax.numpy as jnp
import numpy as np
from jax.experimental import pallas as pl
from jax.experimental.pallas import tpu as pltpu


# ---------------------------------------------------------------------------
# helpers
# ---------------------------------------------------------------------------
def _round_up(x, m):
    return ((x + m - 1) // m) * m


def _pad2d(x, rows, cols):
    r, c = x.shape
    return jnp.pad(x, ((0, rows - r), (0, cols - c)))


def _quantize_adj(adj):
    """Symmetric int8 quantization; dequant scale applied in the kernel epilogue."""
    amax = jnp.max(jnp.abs(adj))
    scale = jnp.where(amax > 0, amax, 1.0) / 127.0
    q = jnp.round(adj / scale).astype(jnp.int8)
    return q, scale


def _choose_tiling(n, f_in_max):
    """Pick (n_pad, tm, tk).

    * Pad N only to what the tiles need (not a blanket 512 multiple).
    * tm (dst tile) grows with feature width: every dst tile re-streams H, so
      H traffic ~ (n_pad/tm) * n_pad * f_in.
    * Keep >= 2 dst tiles so the 'parallel' axis can shard across v7x's 2 TCs.
    """
    n_pad = _round_up(n, 128)

    def pick(cands):
        for c in cands:
            if n_pad % c == 0:
                return c
        return 128  # unreachable: 128 divides n_pad

    tk = pick((512, 256, 128))
    tm_want = 512 if f_in_max >= 256 else 256
    tm = pick(tuple(c for c in (512, 256, 128) if c <= tm_want))
    while n_pad // tm < 2 and tm > 64:
        tm //= 2
    return n_pad, tm, tk


def _build_tile_tables(adj_pattern, tm, tk):
    """Per-dst-tile lists of nonzero src tiles (block-sparse skip tables).

    Returns (flat table (n_i*max_k,), counts (n_i,), max_k).  Padded entries
    repeat the last valid src tile so padded grid steps re-use the same DMA.
    """
    n_pad = adj_pattern.shape[0]
    n_i, n_k = n_pad // tm, n_pad // tk
    nz = (adj_pattern != 0).reshape(n_i, tm, n_k, tk).any(axis=(1, 3))
    cnt = nz.sum(axis=1).astype(np.int32)
    max_k = max(1, int(cnt.max()))
    tbl = np.zeros((n_i, max_k), dtype=np.int32)
    for i in range(n_i):
        idx = np.nonzero(nz[i])[0]
        if idx.size:
            tbl[i, :idx.size] = idx
            tbl[i, idx.size:] = idx[-1]
    return jnp.asarray(tbl.reshape(-1)), jnp.asarray(cnt), max_k


# ---------------------------------------------------------------------------
# kernel
# ---------------------------------------------------------------------------
def _sage_layer_kernel(kt_ref, cnt_ref,                       # scalar prefetch
                       adj_ref, hsrc_ref, hdst_ref, deg_ref,
                       ws_ref, wn_ref, b_ref,                 # inputs
                       out_ref,                               # output
                       acc_ref,                               # scratch
                       *, apply_relu, tk, max_k, h_resident):
    i = pl.program_id(0)
    k = pl.program_id(1)

    @pl.when(k == 0)
    def _():
        acc_ref[...] = jnp.zeros_like(acc_ref)

    # Accumulate only over this dst tile's nonzero src tiles (block-sparse
    # skip).  Padded k-steps repeat the previous block index (no new DMA) and
    # skip the MXU work entirely.
    @pl.when(k < cnt_ref[i])
    def _():
        # int8 adjacency -> bf16 for the MXU; dequant scale applied in epilogue.
        a_tile = adj_ref[...].astype(jnp.bfloat16)
        if h_resident:
            src_blk = kt_ref[i * max_k + k]
            start = pl.multiple_of(src_blk * tk, tk)
            h_blk = hsrc_ref[pl.ds(start, tk), :]
        else:
            h_blk = hsrc_ref[...]
        acc_ref[...] += jnp.dot(a_tile, h_blk,
                                preferred_element_type=jnp.float32)

    @pl.when(k == pl.num_programs(1) - 1)
    def _():
        # fn.mean (1/in-degree) and the int8 dequant scale, once, in f32.
        neigh = (acc_ref[...] * deg_ref[...]).astype(hdst_ref.dtype)
        # Two K=f_in projections accumulated in f32 (no concat materialization).
        out = (jnp.dot(hdst_ref[...], ws_ref[...],
                       preferred_element_type=jnp.float32)
               + jnp.dot(neigh, wn_ref[...],
                         preferred_element_type=jnp.float32)
               + b_ref[...])
        if apply_relu:
            out = jnp.maximum(out, 0.0)
        out_ref[...] = out.astype(out_ref.dtype)


def sage_layer(adj_q, kt_tbl, kt_cnt, deg_scale, h, w_self, w_neigh, bias, *,
               apply_relu, out_dtype, tm, tk, max_k,
               h_resident_max_bytes=4 * 1024 * 1024):
    """One SAGE layer on padded inputs.

    adj_q     : (Np, Np)   int8   quantized adjacency A[dst, src]
    kt_tbl    : (Ni*max_k,) int32 nonzero src-tile ids per dst tile (flattened)
    kt_cnt    : (Ni,)      int32  number of nonzero src tiles per dst tile
    deg_scale : (Np, 1)    f32    deg_inv * dequant_scale
    h         : (Np, Fi)   bf16   node features, Fi multiple of 128
    w_self/w_neigh : (Fi, Fo) bf16, Fo multiple of 128
    bias      : (1, Fo)    f32    b_self + b_neigh
    """
    n_pad = adj_q.shape[0]
    f_in = h.shape[1]
    f_out = w_self.shape[1]
    n_i = n_pad // tm
    assert n_pad % tm == 0 and n_pad % tk == 0

    # Keep the whole H resident in VMEM when small enough (eliminates all
    # redundant H-src re-reads); x2 accounts for Pallas double-buffering.
    h_bytes = n_pad * f_in * h.dtype.itemsize
    h_resident = 2 * h_bytes <= h_resident_max_bytes

    if h_resident:
        hsrc_spec = pl.BlockSpec((n_pad, f_in), lambda i, k, kt, cnt: (0, 0))
    else:
        hsrc_spec = pl.BlockSpec(
            (tk, f_in), lambda i, k, kt, cnt: (kt[i * max_k + k], 0))

    kernel = functools.partial(_sage_layer_kernel, apply_relu=apply_relu,
                               tk=tk, max_k=max_k, h_resident=h_resident)

    # Advisory roofline numbers for XLA's scheduler.
    nnz_tiles = int(jnp.asarray(kt_cnt).sum())
    out_bytes = jnp.dtype(out_dtype).itemsize
    flops = 2 * nnz_tiles * tm * tk * f_in + 4 * n_pad * f_in * f_out
    bytes_accessed = (nnz_tiles * tm * tk                                # int8 A
                      + (h_bytes if h_resident else nnz_tiles * tk * f_in * 2)
                      + n_pad * f_in * 2                                 # H dst
                      + 2 * f_in * f_out * 2                             # weights
                      + n_pad * 4 + f_out * 4                            # deg, bias
                      + n_pad * f_out * out_bytes)                       # output
    cost = pl.CostEstimate(flops=flops, transcendentals=0,
                           bytes_accessed=bytes_accessed)

    grid_spec = pltpu.PrefetchScalarGridSpec(
        num_scalar_prefetch=2,
        grid=(n_i, max_k),
        in_specs=[
            pl.BlockSpec((tm, tk),
                         lambda i, k, kt, cnt: (i, kt[i * max_k + k])),  # A tile
            hsrc_spec,                                                   # H (src)
            pl.BlockSpec((tm, f_in), lambda i, k, kt, cnt: (i, 0)),      # H (dst)
            pl.BlockSpec((tm, 1), lambda i, k, kt, cnt: (i, 0)),         # deg*scale
            pl.BlockSpec((f_in, f_out), lambda i, k, kt, cnt: (0, 0)),   # W_self
            pl.BlockSpec((f_in, f_out), lambda i, k, kt, cnt: (0, 0)),   # W_neigh
            pl.BlockSpec((1, f_out), lambda i, k, kt, cnt: (0, 0)),      # bias
        ],
        out_specs=pl.BlockSpec((tm, f_out), lambda i, k, kt, cnt: (i, 0)),
        scratch_shapes=[pltpu.VMEM((tm, f_in), jnp.float32)],            # acc
    )

    # NOTE: pipeline_mode=pl.Buffered(1) on the constant W/bias specs and a
    # v7x MRB-chained k-reduction are further VMEM / load-store wins that are
    # intentionally left out here to stay portable across jax versions.
    return pl.pallas_call(
        kernel,
        out_shape=jax.ShapeDtypeStruct((n_pad, f_out), out_dtype),
        grid_spec=grid_spec,
        compiler_params=pltpu.CompilerParams(
            dimension_semantics=("parallel", "arbitrary"),
            # 48 MiB fits v7x's 64 MiB physical VMEM with headroom; on
            # v5e/v6e it merely raises the (16/32 MiB) scoped default.
            vmem_limit_bytes=48 * 1024 * 1024),
        cost_estimate=cost,
    )(kt_tbl, kt_cnt, adj_q, h, h, deg_scale, w_self, w_neigh, bias)


# ---------------------------------------------------------------------------
# model wrapper (host-side preprocessing + per-layer kernel calls)
# ---------------------------------------------------------------------------
def _init_linear(key, f_in, f_out):
    """nn.Linear-style init: U(-1/sqrt(f_in), 1/sqrt(f_in)); weight as (F_in, F_out)."""
    kw, kb = jax.random.split(key)
    bound = 1.0 / float(f_in) ** 0.5
    w = jax.random.uniform(kw, (f_in, f_out), jnp.float32, -bound, bound)
    b = jax.random.uniform(kb, (1, f_out), jnp.float32, -bound, bound)
    return w, b


def init_graphsage_params(key, in_feats, n_hidden, n_classes, n_layers):
    """Matches GraphSAGE.__init__: 1 + (n_layers-1) hidden layers + 1 output layer."""
    dims = [(in_feats, n_hidden)]
    dims += [(n_hidden, n_hidden)] * (n_layers - 1)
    dims += [(n_hidden, n_classes)]
    params = []
    for (fi, fo) in dims:
        key, k_self, k_neigh = jax.random.split(key, 3)
        w_s, b_s = _init_linear(k_self, fi, fo)
        w_n, b_n = _init_linear(k_neigh, fi, fo)
        params.append((w_s, b_s, w_n, b_n))
    return params


def graphsage_forward(params, adj_weighted, adj_unweighted, deg_inv, features,
                      *, h_resident_max_bytes=4 * 1024 * 1024):
    n, in_feats = features.shape
    n_classes = params[-1][0].shape[1]

    f_pad_max = max(_round_up(in_feats, 128),
                    max(_round_up(w_s.shape[0], 128) for (w_s, _, _, _) in params))
    n_pad, tm, tk = _choose_tiling(n, f_pad_max)

    # int8 adjacency (quarter of f32 bytes on the dominant N^2 HBM stream);
    # dequant scale + 1/in-degree applied in f32 in the kernel epilogue.
    adj_w_q, scale_w = _quantize_adj(adj_weighted)
    adj_u_q, scale_u = _quantize_adj(adj_unweighted)
    adj_w_q = _pad2d(adj_w_q, n_pad, n_pad)
    adj_u_q = _pad2d(adj_u_q, n_pad, n_pad)

    deg_scale_w = _pad2d(deg_inv * scale_w, n_pad, 1).astype(jnp.float32)
    deg_scale_u = _pad2d(deg_inv * scale_u, n_pad, 1).astype(jnp.float32)

    # Block-sparse skip tables (same sparsity pattern for both adjacencies).
    kt_tbl, kt_cnt, max_k = _build_tile_tables(np.asarray(adj_u_q), tm, tk)

    # Lane-dense bf16 node features.
    h = _pad2d(features, n_pad, _round_up(in_feats, 128)).astype(jnp.bfloat16)

    # Per-layer padded weights (two blocks, no concat) and pre-summed bias.
    layer_data = []
    for (w_s, b_s, w_n, b_n) in params:
        fi, fo = w_s.shape
        fi_p, fo_p = _round_up(fi, 128), _round_up(fo, 128)
        layer_data.append((
            _pad2d(w_s, fi_p, fo_p).astype(jnp.bfloat16),
            _pad2d(w_n, fi_p, fo_p).astype(jnp.bfloat16),
            _pad2d(b_s + b_n, 1, fo_p).astype(jnp.float32),
        ))

    # Hidden SAGEConvLink layers: edge-weighted mean + ReLU, bf16 activations.
    for (w_s_p, w_n_p, bias) in layer_data[:-1]:
        h = sage_layer(adj_w_q, kt_tbl, kt_cnt, deg_scale_w, h, w_s_p, w_n_p,
                       bias, apply_relu=True, out_dtype=jnp.bfloat16,
                       tm=tm, tk=tk, max_k=max_k,
                       h_resident_max_bytes=h_resident_max_bytes)

    # Final plain SAGEConv: unweighted mean, no activation, f32 logits.
    w_s_p, w_n_p, bias = layer_data[-1]
    out = sage_layer(adj_u_q, kt_tbl, kt_cnt, deg_scale_u, h, w_s_p, w_n_p,
                     bias, apply_relu=False, out_dtype=jnp.float32,
                     tm=tm, tk=tk, max_k=max_k,
                     h_resident_max_bytes=h_resident_max_bytes)
    return out[:n, :n_classes]


def graphsage_reference(params, adj_weighted, adj_unweighted, deg_inv, features):
    """Pure-JAX reference mirroring the kernel's int8/bf16 rounding points."""
    def bf(x):
        return x.astype(jnp.bfloat16).astype(jnp.float32)

    qw, sw = _quantize_adj(adj_weighted)
    qu, su = _quantize_adj(adj_unweighted)
    aw, au = qw.astype(jnp.float32), qu.astype(jnp.float32)

    h = bf(features)
    n_layers = len(params)
    for li, (w_s, b_s, w_n, b_n) in enumerate(params):
        if li == n_layers - 1:
            a, s = au, su
        else:
            a, s = aw, sw
        neigh = bf((a @ h) * (deg_inv * s))
        out = h @ bf(w_s) + neigh @ bf(w_n) + (b_s + b_n)
        if li < n_layers - 1:
            out = bf(jnp.maximum(out, 0.0))
        h = out
    return h


if __name__ == "__main__":
    key = jax.random.PRNGKey(0)

    # Small synthetic graph + features (exercises padding 300 -> 384, the
    # block-sparse skip, padded k-steps, and zero-in-degree nodes).
    N = 300
    IN_FEATS = 48
    N_HIDDEN = 64
    N_CLASSES = 10
    N_LAYERS = 2    # -> 3 SAGE layers total (as in GraphSAGE.__init__)

    k_feat, k_mask, k_w, k_params = jax.random.split(key, 4)

    features = jax.random.normal(k_feat, (N, IN_FEATS), jnp.float32)

    dst = jnp.arange(N)[:, None]
    src = jnp.arange(N)[None, :]
    allowed = (src // 128) <= (dst // 128)          # block-structured sparsity
    isolated = (dst % 17) == 0                      # some zero-in-degree nodes
    u = jax.random.uniform(k_mask, (N, N))
    edge_mask = ((u < 0.15) & allowed & jnp.logical_not(isolated)).astype(jnp.float32)
    edge_w = jax.random.uniform(k_w, (N, N), jnp.float32, 0.1, 1.0)
    adj_unweighted = edge_mask                      # A[dst, src] = 1 if edge
    adj_weighted = edge_mask * edge_w               # A[dst, src] = edge_weight

    in_deg = jnp.sum(edge_mask, axis=1, keepdims=True)
    deg_inv = jnp.where(in_deg > 0, 1.0 / jnp.maximum(in_deg, 1.0), 0.0)

    params = init_graphsage_params(k_params, IN_FEATS, N_HIDDEN, N_CLASSES,
                                   N_LAYERS)

    ref = graphsage_reference(params, adj_weighted, adj_unweighted, deg_inv,
                              features)

    # Resident-H fast path (whole feature matrix kept in VMEM).
    out = graphsage_forward(params, adj_weighted, adj_unweighted, deg_inv,
                            features)
    out = jax.block_until_ready(out)
    assert out.shape == (N, N_CLASSES) and out.dtype == jnp.float32
    assert bool(jnp.all(jnp.isfinite(out)))
    assert bool(jnp.allclose(out, ref, atol=5e-2, rtol=5e-2))

    # Streamed-H path (src tiles gathered via the scalar-prefetch index_map).
    out2 = graphsage_forward(params, adj_weighted, adj_unweighted, deg_inv,
                             features, h_resident_max_bytes=0)
    out2 = jax.block_until_ready(out2)
    assert bool(jnp.allclose(out2, ref, atol=5e-2, rtol=5e-2))

    print("KERNEL_OK")
</pallas_src>

<mosaic_0001>
module attributes {stable_mosaic.version = 11 : i64} {
  func.func @_sage_layer_kernel(%arg0: i32, %arg1: i32, %arg2: memref<9xi32, #tpu.memory_space<smem>>, %arg3: memref<3xi32, #tpu.memory_space<smem>>, %arg4: memref<128x128xi8, #tpu.memory_space<vmem>>, %arg5: memref<384x128xbf16, #tpu.memory_space<vmem>>, %arg6: memref<128x128xbf16, #tpu.memory_space<vmem>>, %arg7: memref<128x1xf32, #tpu.memory_space<vmem>>, %arg8: memref<128x128xbf16, #tpu.memory_space<vmem>>, %arg9: memref<128x128xbf16, #tpu.memory_space<vmem>>, %arg10: memref<1x128xf32, #tpu.memory_space<vmem>>, %arg11: memref<128x128xbf16, #tpu.memory_space<vmem>>, %arg12: memref<128x128xf32, #tpu.memory_space<vmem>>) attributes {dimension_semantics = [#tpu.dimension_semantics<parallel>, #tpu.dimension_semantics<arbitrary>], iteration_bounds = array<i64: 3, 3>, scalar_prefetch = 2 : i64, scratch_operands = 1 : i64, tpu.core_type = #tpu.core_type<tc>, window_params = [{transform_indices = @transform_0, window_bounds = array<i64: 128, 128>}, {pipeline_mode = #tpu.pipeline_mode<synchronous>, transform_indices = @transform_1, window_bounds = array<i64: 384, 128>}, {transform_indices = @transform_2, window_bounds = array<i64: 128, 128>}, {transform_indices = @transform_3, window_bounds = array<i64: 128, 1>}, {pipeline_mode = #tpu.pipeline_mode<synchronous>, transform_indices = @transform_4, window_bounds = array<i64: 128, 128>}, {pipeline_mode = #tpu.pipeline_mode<synchronous>, transform_indices = @transform_5, window_bounds = array<i64: 128, 128>}, {pipeline_mode = #tpu.pipeline_mode<synchronous>, transform_indices = @transform_6, window_bounds = array<i64: 1, 128>}, {transform_indices = @transform_7, window_bounds = array<i64: 128, 128>}]} {
    %c0_i32 = arith.constant 0 : i32
    %0 = arith.cmpi eq, %arg1, %c0_i32 : i32
    %1 = arith.extui %0 : i1 to i32
    %c0_i32_0 = arith.constant 0 : i32
    %2 = arith.cmpi ne, %1, %c0_i32_0 : i32
    scf.if %2 {
      %cst = arith.constant 0.000000e+00 : f32
      %11 = vector.broadcast %cst : f32 to vector<128x128xf32>
      %c0 = arith.constant 0 : index
      %c0_3 = arith.constant 0 : index
      %12 = vector.load %arg12[%c0, %c0_3] : memref<128x128xf32, #tpu.memory_space<vmem>>, vector<128x128xf32>
      tpu.vector_store %arg12[%c0, %c0_3], %11 {strides = array<i32>} : memref<128x128xf32, #tpu.memory_space<vmem>>, vector<128x128xf32>,
    } else {
    }
    %3 = arith.index_cast %arg0 : i32 to index
    %4 = memref.load %arg3[%3] : memref<3xi32, #tpu.memory_space<smem>>
    %5 = arith.cmpi slt, %arg1, %4 : i32
    %6 = arith.extui %5 : i1 to i32
    %c0_i32_1 = arith.constant 0 : i32
    %7 = arith.cmpi ne, %6, %c0_i32_1 : i32
    scf.if %7 {
      %c0 = arith.constant 0 : index
      %c0_3 = arith.constant 0 : index
      %11 = vector.load %arg4[%c0, %c0_3] : memref<128x128xi8, #tpu.memory_space<vmem>>, vector<128x128xi8>
      %12 = arith.sitofp %11 : vector<128x128xi8> to vector<128x128xbf16>
      %c3_i32 = arith.constant 3 : i32
      %13 = arith.muli %arg0, %c3_i32 : i32
      %14 = arith.addi %13, %arg1 : i32
      %15 = arith.index_cast %14 : i32 to index
      %16 = memref.load %arg2[%15] : memref<9xi32, #tpu.memory_space<smem>>
      %c128_i32 = arith.constant 128 : i32
      %17 = arith.muli %16, %c128_i32 : i32
      %18 = tpu.assume_multiple %17, 128 : i32
      %19 = arith.index_cast %18 : i32 to index
      %c0_4 = arith.constant 0 : index
      %20 = vector.load %arg5[%19, %c0_4] : memref<384x128xbf16, #tpu.memory_space<vmem>>, vector<128x128xbf16>
      %c0_5 = arith.constant 0 : index
      %c0_6 = arith.constant 0 : index
      %21 = vector.load %arg12[%c0_5, %c0_6] : memref<128x128xf32, #tpu.memory_space<vmem>>, vector<128x128xf32>
      %cst = arith.constant dense<0.000000e+00> : vector<128x128xf32>
      %22 = tpu.matmul %12, %20, %cst {dimension_numbers = #tpu.dot_dimension_numbers<[1], [0], [0], [1], [0, 0, 1, 1], [], []>} : vector<128x128xbf16>, vector<128x128xbf16>, vector<128x128xf32> -> vector<128x128xf32>
      %23 = arith.addf %21, %22 : vector<128x128xf32>
      %c0_7 = arith.constant 0 : index
      %c0_8 = arith.constant 0 : index
      %24 = vector.load %arg12[%c0_7, %c0_8] : memref<128x128xf32, #tpu.memory_space<vmem>>, vector<128x128xf32>
      tpu.vector_store %arg12[%c0_7, %c0_8], %23 {strides = array<i32>} : memref<128x128xf32, #tpu.memory_space<vmem>>, vector<128x128xf32>,
    } else {
    }
    %c2_i32 = arith.constant 2 : i32
    %8 = arith.cmpi eq, %arg1, %c2_i32 : i32
    %9 = arith.extui %8 : i1 to i32
    %c0_i32_2 = arith.constant 0 : i32
    %10 = arith.cmpi ne, %9, %c0_i32_2 : i32
    scf.if %10 {
      %c0 = arith.constant 0 : index
      %c0_3 = arith.constant 0 : index
      %11 = vector.load %arg12[%c0, %c0_3] : memref<128x128xf32, #tpu.memory_space<vmem>>, vector<128x128xf32>
      %c0_4 = arith.constant 0 : index
      %c0_5 = arith.constant 0 : index
      %12 = vector.load %arg7[%c0_4, %c0_5] : memref<128x1xf32, #tpu.memory_space<vmem>>, vector<128x1xf32>
      %13 = vector.broadcast %12 : vector<128x1xf32> to vector<128x128xf32>
      %14 = arith.mulf %11, %13 : vector<128x128xf32>
      %15 = arith.truncf %14 : vector<128x128xf32> to vector<128x128xbf16>
      %c0_6 = arith.constant 0 : index
      %c0_7 = arith.constant 0 : index
      %16 = vector.load %arg6[%c0_6, %c0_7] : memref<128x128xbf16, #tpu.memory_space<vmem>>, vector<128x128xbf16>
      %c0_8 = arith.constant 0 : index
      %c0_9 = arith.constant 0 : index
      %17 = vector.load %arg8[%c0_8, %c0_9] : memref<128x128xbf16, #tpu.memory_space<vmem>>, vector<128x128xbf16>
      %cst = arith.constant dense<0.000000e+00> : vector<128x128xf32>
      %18 = tpu.matmul %16, %17, %cst {dimension_numbers = #tpu.dot_dimension_numbers<[1], [0], [0], [1], [0, 0, 1, 1], [], []>} : vector<128x128xbf16>, vector<128x128xbf16>, vector<128x128xf32> -> vector<128x128xf32>
      %c0_10 = arith.constant 0 : index
      %c0_11 = arith.constant 0 : index
      %19 = vector.load %arg9[%c0_10, %c0_11] : memref<128x128xbf16, #tpu.memory_space<vmem>>, vector<128x128xbf16>
      %cst_12 = arith.constant dense<0.000000e+00> : vector<128x128xf32>
      %20 = tpu.matmul %15, %19, %cst_12 {dimension_numbers = #tpu.dot_dimension_numbers<[1], [0], [0], [1], [0, 0, 1, 1], [], []>} : vector<128x128xbf16>, vector<128x128xbf16>, vector<128x128xf32> -> vector<128x128xf32>
      %21 = arith.addf %18, %20 : vector<128x128xf32>
      %c0_13 = arith.constant 0 : index
      %c0_14 = arith.constant 0 : index
      %22 = vector.load %arg10[%c0_13, %c0_14] : memref<1x128xf32, #tpu.memory_space<vmem>>, vector<1x128xf32>
      %23 = vector.broadcast %22 : vector<1x128xf32> to vector<128x128xf32>
      %24 = arith.addf %21, %23 : vector<128x128xf32>
      %cst_15 = arith.constant 0.000000e+00 : f32
      %25 = vector.broadcast %cst_15 : f32 to vector<128x128xf32>
      %26 = arith.maximumf %24, %25 : vector<128x128xf32>
      %27 = arith.truncf %26 : vector<128x128xf32> to vector<128x128xbf16>
      %c0_16 = arith.constant 0 : index
      %c0_17 = arith.constant 0 : index
      %28 = vector.load %arg11[%c0_16, %c0_17] : memref<128x128xbf16, #tpu.memory_space<vmem>>, vector<128x128xbf16>
      tpu.vector_store %arg11[%c0_16, %c0_17], %27 {strides = array<i32>} : memref<128x128xbf16, #tpu.memory_space<vmem>>, vector<128x128xbf16>,
    } else {
    }
    return
  }
  func.func @transform_0(%arg0: i32, %arg1: i32, %arg2: memref<9xi32, #tpu.memory_space<smem>>, %arg3: memref<3xi32, #tpu.memory_space<smem>>) -> (i32, i32) {
    %c3_i32 = arith.constant 3 : i32
    %0 = arith.muli %arg0, %c3_i32 : i32
    %1 = arith.addi %0, %arg1 : i32
    %2 = arith.index_cast %1 : i32 to index
    %3 = memref.load %arg2[%2] : memref<9xi32, #tpu.memory_space<smem>>
    %c0_i32 = arith.constant 0 : i32
    return %arg0, %3 : i32, i32
  }
  func.func @transform_1(%arg0: i32, %arg1: i32, %arg2: memref<9xi32, #tpu.memory_space<smem>>, %arg3: memref<3xi32, #tpu.memory_space<smem>>) -> (i32, i32) {
    %c0_i32 = arith.constant 0 : i32
    %c0_i32_0 = arith.constant 0 : i32
    %c0_i32_1 = arith.constant 0 : i32
    return %c0_i32, %c0_i32_0 : i32, i32
  }
  func.func @transform_2(%arg0: i32, %arg1: i32, %arg2: memref<9xi32, #tpu.memory_space<smem>>, %arg3: memref<3xi32, #tpu.memory_space<smem>>) -> (i32, i32) {
    %c0_i32 = arith.constant 0 : i32
    %c0_i32_0 = arith.constant 0 : i32
    return %arg0, %c0_i32 : i32, i32
  }
  func.func @transform_3(%arg0: i32, %arg1: i32, %arg2: memref<9xi32, #tpu.memory_space<smem>>, %arg3: memref<3xi32, #tpu.memory_space<smem>>) -> (i32, i32) {
    %c0_i32 = arith.constant 0 : i32
    %c0_i32_0 = arith.constant 0 : i32
    return %arg0, %c0_i32 : i32, i32
  }
  func.func @transform_4(%arg0: i32, %arg1: i32, %arg2: memref<9xi32, #tpu.memory_space<smem>>, %arg3: memref<3xi32, #tpu.memory_space<smem>>) -> (i32, i32) {
    %c0_i32 = arith.constant 0 : i32
    %c0_i32_0 = arith.constant 0 : i32
    %c0_i32_1 = arith.constant 0 : i32
    return %c0_i32, %c0_i32_0 : i32, i32
  }
  func.func @transform_5(%arg0: i32, %arg1: i32, %arg2: memref<9xi32, #tpu.memory_space<smem>>, %arg3: memref<3xi32, #tpu.memory_space<smem>>) -> (i32, i32) {
    %c0_i32 = arith.constant 0 : i32
    %c0_i32_0 = arith.constant 0 : i32
    %c0_i32_1 = arith.constant 0 : i32
    return %c0_i32, %c0_i32_0 : i32, i32
  }
  func.func @transform_6(%arg0: i32, %arg1: i32, %arg2: memref<9xi32, #tpu.memory_space<smem>>, %arg3: memref<3xi32, #tpu.memory_space<smem>>) -> (i32, i32) {
    %c0_i32 = arith.constant 0 : i32
    %c0_i32_0 = arith.constant 0 : i32
    %c0_i32_1 = arith.constant 0 : i32
    return %c0_i32, %c0_i32_0 : i32, i32
  }
  func.func @transform_7(%arg0: i32, %arg1: i32, %arg2: memref<9xi32, #tpu.memory_space<smem>>, %arg3: memref<3xi32, #tpu.memory_space<smem>>) -> (i32, i32) {
    %c0_i32 = arith.constant 0 : i32
    %c0_i32_0 = arith.constant 0 : i32
    return %arg0, %c0_i32 : i32, i32
  }
}

</mosaic_0001>

<bundles_post_ra>
// kernel: tpu_custom_call.1
= control target key start
LH: loop header
LB: loop body
LE: loop exit
PB: predicated region body
PF: predicated region fallthrough
CT: control target
= control target key end

     0   :  { %s2716_s0 = inlined_call_operand.vmem [shape: s32[9], index: 0, kind: input, shape index: {}]   ;;  %s2717_s2 = inlined_call_operand.vmem [shape: s8[384,384], index: 2, kind: input, shape index: {}]   ;;  %s2718_s3 = inlined_call_operand.hbm [shape: bf16[384,128], index: 3, kind: input, shape index: {}]   ;;  %s2719_s4 = inlined_call_operand.hbm [shape: bf16[384,128], index: 4, kind: input, shape index: {}]   ;;  %s2720_s5 = inlined_call_operand.vmem [shape: f32[384,1], index: 5, kind: input, shape index: {}]   ;;  %s2721_s6 = inlined_call_operand.vmem [shape: bf16[128,128], index: 6, kind: input, shape index: {}]   ;;  %s2722_s7 = inlined_call_operand.hbm [shape: bf16[128,128], index: 7, kind: input, shape index: {}]   ;;  %s2723_s8 = inlined_call_operand.vmem [shape: f32[1,128], index: 8, kind: input, shape index: {}]   ;;  %s2724_s9 = inlined_call_operand.hbm [shape: bf16[384,128], index: 9, kind: output, shape index: {}]   ;;  %s2725_s1 = inlined_call_operand.vmem [shape: s32[3], index: 1, kind: input, shape index: {}]  }
   0x1   :  { %2740 = sst [smem:[#allocation28_spill]] %s2720_s5  ;;  %s14_s11 = sshll.u32 %s2716_s0, 4  ;;  %s15_s11 = int_to_ptr.vmem [resolvable:$true] %s14_s11 }
   0x2   :  { %2741 = sst [smem:[#allocation29_spill]] %s2721_s6  ;;  %s18_s14 = sshll.u32 %s2725_s1, 4  ;;  %s19_s14 = int_to_ptr.vmem [resolvable:$true] %s18_s14 }
   0x3   :  { %2742 = sst [smem:[#allocation30_spill]] %s2723_s8  ;;  %s1987_s15 = scalar_lea.vmem %s15_s11, 16 }
   0x4   :  { %2743 = sst [smem:[#allocation31_spill]] %s2724_s9  ;;  %p1988_p0 = scmp.ne.s32.totalorder %s15_s11, %s1987_s15 }
   0x5   :  { %p1992_p1 = scmp.lt.s32.totalorder %s15_s11, %s15_s11  ;;  %p1993_p2 = scmp.lt.s32.totalorder %s1987_s15, %s1987_s15 }
   0x7   :  { %p1994_p3 = por %p1993_p2, %p1992_p1 }
   0x9   :  { %p1995_p4 = pnand %p1994_p3, %p1988_p0 }
   0xb   :  { %1998 = shalt.err (!%p1995_p4)  }
   0xc   :  { %s2221_s16 = smov [#allocation4]   ;;  %s1999_s17 = scalar_lea.vmem %s19_s14, 16 }
   0xd   :  { %17 = dma.vmem_to_smem %s15_s11, 16, %s2221_s16, [#allocation3] }
   0xe   :  { %p2000_p5 = scmp.ne.s32.totalorder %s19_s14, %s1999_s17  ;;  %p2004_p6 = scmp.lt.s32.totalorder %s19_s14, %s19_s14 }
   0xf   :  { %p2005_p7 = scmp.lt.s32.totalorder %s1999_s17, %s1999_s17 }
  0x11   :  { %p2006_p8 = por %p2005_p7, %p2004_p6 }
  0x13   :  { %p2007_p9 = pnand %p2006_p8, %p2000_p5 }
  0x15   :  { %2010 = shalt.err (!%p2007_p9)  }
  0x16   :  { %s2222_s0 = smov [#allocation5]  }
  0x17   :  { %21 = dma.vmem_to_smem %s19_s14, 16, %s2222_s0, [#allocation3] }
  0x18   :  { %2163 = dma.done.wait [#allocation3], 32 }
  0x19   :  { %2164 = vsyncadd [#allocation3], 4294967264 }
  0x1a   :  { %23 = sfence }
  0x1b   :  { %24 = vsyncpa [#allocation8], 0 }
  0x1c   :  { %25 = vsyncpa [#allocation11], 0 }
  0x1d   :  { %27 = vsyncpa [#allocation11 + $0x1], 0 }
  0x1e   :  { %28 = vsyncpa [#allocation9], 0 }
  0x1f   :  { %30 = vsyncpa [#allocation9 + $0x1], 0  ;;  %s2291_s1 = smov 0   ;;  %s2293_s18 = smov 0  }
  0x20   :  { %s2295_s19 = smov 0   ;;  %s2297_s20 = smov 0  }
  0x21   :  { %s2299_s21 = smov 0   ;;  %s2301_s22 = smov 0  }
  0x22   :  { %s2303_s23 = smov 0   ;;  %s2305_s24 = smov 0  }
  0x23   :  { %s2307_s25 = smov 0   ;;  %s2309_s26 = smov 0  }
  0x24 LB: > { %2744 = sst [smem:[#allocation19_spill]] %s2183_s1  ;;  %s2342_s27 = sadd.s32 4294967295, %s2219_s26   ;;  %s2219_s26 = sphi %s2309_s26, %s36_s26   ;;  %s2215_s25 = sphi %s2307_s25, %s2794_s25   ;;  %s2211_s24 = sphi %s2305_s24, %s2785_s24   ;;  %s2207_s23 = sphi %s2303_s23, %s2793_s23   ;;  %s2203_s22 = sphi %s2301_s22, %s2792_s22   ;;  %s2199_s21 = sphi %s2299_s21, %s2791_s21   ;;  %s2195_s20 = sphi %s2297_s20, %s2790_s20   ;;  %s2191_s19 = sphi %s2295_s19, %s2789_s19   ;;  %s2187_s18 = sphi %s2293_s18, %s2788_s18   ;;  %s2183_s1 = sphi %s2291_s1, %s2787_s1  }
  0x25   : > { %2745 = sst [smem:[#allocation20_spill]] %s2203_s22  ;;  %s1512_s28 = sadd.s32 4294967294, %s2219_s26  }
  0x26   : > { %2746 = sst [smem:[#allocation21_spill]] %s2211_s24  ;;  %s45_s29 = sadd.s32 1, %s2211_s24 }
  0x27   : > { %s48_s30 = sadd.s32 1, %s2215_s25  ;;  %p46_p10 = scmp.ge.s32.totalorder %s45_s29, 3 }
  0x28   : > { %s52_s10 = smul.u32 3, %s2215_s25  ;;  %p70_p11 = scmp.ne.s32.totalorder %s2199_s21, %s2195_s20 }
  0x29   : > { %s2796_s29 = smov (%p46_p10, %s45_s29), 0  ;;  %s2798_s30 = smov (!%p46_p10, %s48_s30), %s2215_s25 }
  0x2a   : > { %2747 = sst [smem:[#allocation22_spill]] %s2796_s29  ;;  %s2355_s12 = sadd.s32 %s2211_s24, %s52_s10 }
  0x2b   : > { %p71_p12 = scmp.eq.s32.totalorder %s2219_s26, 0  ;;  %p50_p13 = scmp.ge.s32.totalorder %s2798_s30, 3 }
  0x2c   : > { %s54_s13 = sld [smem:[#allocation4 + %s2355_s12]]  ;;  %s110_s15 = sadd.s32 1, %s2191_s19 }
  0x2d   : > { %p2359_p0 = por %p71_p12, %p70_p11  ;;  %s2800_s30 = smov (%p50_p13, %s2798_s30), 0 }
  0x2e   : > { %2749 = sst [smem:[#allocation23_spill]] %s2800_s30  ;;  %p117_p1 = scmp.ne.s32.totalorder %s2191_s19, %s2187_s18 }
  0x2f   : > { %s2748_s14 = scalar_select %p2359_p0, 1, 0 }
  0x30   : > { %p123_p2 = scmp.ne.s32.totalorder %s2187_s18, %s2183_s1  ;;  %s55_s16 = smul.u32 3, %s2800_s30 }
  0x31   : > { %s58_s17 = ssub.s32 %s2215_s25, %s2800_s30  ;;  %p2373_p4 = por %p117_p1, %p71_p12 }
  0x32   : > { %p108_p3 = scmp.eq.s32.totalorder %s58_s17, 0  ;;  %s56_s10 = sadd.s32 %s55_s16, %s2796_s29 }
  0x33   : > { %s2750_s0 = scalar_select %p2373_p4, 1, 0 }
  0x34   : > { %p2734_p5 = scmp.eq.s32.totalorder %s2342_s27, 0  ;;  %s57_s11 = sld [smem:[#allocation4 + %s56_s10]] }
  0x35   : > { %p236_p6 = scmp.eq.s32.totalorder %s2342_s27, 8  ;;  %p242_p9 = scmp.eq.s32.totalorder %s1512_s28, 8 }
  0x36   : > { %s2381_s24 = scalar_select %p108_p3, %s2191_s19, %s110_s15  }
  0x37   : > { %p2388_p7 = por %p2734_p5, %p123_p2  ;;  %p2392_p8 = por %p236_p6, %p117_p1 }
  0x38   : > { %2751 = sst [smem:[#allocation24_spill]] %s2381_s24  ;;  %p1513_p10 = scmp.ge.s32.totalorder %s2219_s26, 1 }
  0x39   : > { %s2752_s9 = scalar_select %p2388_p7, 1, 0 }
  0x3a   : > { %s2753_s30 = scalar_select %p2392_p8, 1, 0 }
  0x3b   : > { %p249_p11 = scmp.lt.s32.totalorder %s2219_s26, 10  ;;  %p2401_p12 = por %p242_p9, %p123_p2 }
  0x3c   : > { %2754 = sst [smem:[#allocation25_spill]] %s2753_s30  ;;  %s59_s15 = ssub.s32 %s54_s13, %s57_s11 }
  0x3d   : > { %s2755_s16 = scalar_select %p2401_p12, 1, 0 }
  0x3e   : > { %p2405_p13 = pnand %p1513_p10, %p249_p11  ;;  %s60_s29 = sor.u32 %s59_s15, %s58_s17 }
  0x3f   : > { %2756 = sst [smem:[#allocation26_spill]] %s2755_s16  ;;  %s2223_s24 = smov [#allocation7]  }
  0x40   : > { %s2757_s10 = scalar_select %p2405_p13, 1, 0 }
  0x41   : > { %s261_s8 = sshll.u32 %s2223_s24, 4  ;;  %p61_p1 = scmp.eq.s32.totalorder %s60_s29, 0  ;;  %s262_s8 = int_to_ptr.vmem [resolvable:$true] %s261_s8 }
  0x42   : > { %p1845_p3 = pneg %p2405_p13  ;;  %s2758_s28 = sadd.s32 1, %s2199_s21 }
  0x43   : > { %s2414_s30 = scalar_select %p61_p1, %s2199_s21, %s2758_s28  }
  0x44   : > { %p2418_p2 = pnand %p1845_p3, %p2734_p5  ;;  %s2224_s11 = smov [#allocation12]  }
  0x45   : > { %2759 = sst [smem:[#allocation27_spill]] %s2414_s30  ;;  %s277_s13 = sshll.u32 %s2224_s11, 4  ;;  %s278_s13 = int_to_ptr.vmem [resolvable:$true] %s277_s13 }
  0x46   : > { %s2011_s24 = scalar_lea.hbm %s2718_s3, 3072  ;;  %p2013_p9 = pneg %p2418_p2 }
  0x47   : > { %p2012_p6 = scmp.ne.s32.totalorder %s2718_s3, %s2011_s24  ;;  %p2018_p1 = scmp.lt.u32.totalorder %s2011_s24, %s2718_s3 }
  0x49   : > { %p2014_p10 = pnand %p2013_p9, %p2012_p6 }
  0x4b   : > { %p2015_p11 = pneg %p2014_p10 }
  0x4d   : > { %p2020_p3 = pnand %p2018_p1, %p2015_p11 }
  0x4f   : > { %2023 = shalt.err (!%p2020_p3)
}
  0x50   : > { %s2024_s11 = scalar_lea.vmem %s262_s8, 3072  ;;  %p2032_p7 = scmp.lt.s32.totalorder %s262_s8, %s262_s8 }
  0x51   : > { %p2025_p5 = scmp.ne.s32.totalorder %s262_s8, %s2024_s11  ;;  %p2033_p13 = scmp.lt.s32.totalorder %s2024_s11, %s2024_s11 }
  0x53   : > { %p2027_p12 = pnand %p2025_p5, %p2013_p9  ;;  %p2034_p4 = por %p2033_p13, %p2032_p7 }
  0x55   : > { %p2028_p8 = pneg %p2027_p12 }
  0x57   : > { %p2035_p0 = pnand %p2034_p4, %p2028_p8 }
  0x59   : > { %2038 = shalt.err (!%p2035_p0)
}
  0x5a   : > { %s2225_s16 = smov 64   ;;  %s2226_s17 = smov 4  }
  0x5b   : > { %1848 = dma.hbm_to_vmem [thread:$0]  (!%p2418_p2), %s2718_s3, 3072, %s262_s8, [#allocation8], %s2225_s16, %s2225_s16, %s2226_s17  }
  0x5c   : > { %s2039_s28 = scalar_lea.hbm %s2722_s7, 1024 }
  0x5d   : > { %p2040_p5 = scmp.ne.s32.totalorder %s2722_s7, %s2039_s28  ;;  %p2046_p7 = scmp.lt.u32.totalorder %s2039_s28, %s2722_s7 }
  0x5f   : > { %p2042_p0 = pnand %p2040_p5, %p2013_p9 }
  0x61   : > { %p2043_p4 = pneg %p2042_p0 }
  0x63   : > { %p2048_p8 = pnand %p2046_p7, %p2043_p4 }
  0x65   : > { %2051 = shalt.err (!%p2048_p8)
}
  0x66   : > { %s2052_s8 = scalar_lea.vmem %s278_s13, 1024  ;;  %p2060_p10 = scmp.lt.s32.totalorder %s278_s13, %s278_s13 }
  0x67   : > { %p2053_p12 = scmp.ne.s32.totalorder %s278_s13, %s2052_s8  ;;  %p2061_p11 = scmp.lt.s32.totalorder %s2052_s8, %s2052_s8 }
  0x69   : > { %p2055_p13 = pnand %p2053_p12, %p2013_p9  ;;  %p2062_p1 = por %p2061_p11, %p2060_p10 }
  0x6b   : > { %p2056_p6 = pneg %p2055_p13 }
  0x6d   : > { %p2063_p3 = pnand %p2062_p1, %p2056_p6 }
  0x6f   : > { %2066 = shalt.err (!%p2063_p3)
}
  0x70   : > { %1851 = dma.hbm_to_vmem [thread:$0]  (!%p2418_p2), %s2722_s7, 1024, %s278_s13, [#allocation11], %s2225_s16, %s2225_s16, %s2226_s17  }
  0x71   : > { %p1516_p5 = scmp.ge.s32.totalorder %s2219_s26, 9 }
  0x72   : > { %p2761_p0 = scmp.ne.s32.totalorder (!%p1516_p5), %s2748_s14, 0 }
  0x73   : > { %290 = sbr.rel (%p1516_p5) target bundleno = 161 (0xa1), region = 32 }
  0x7a   : > { %293 = sbr.rel (!%p2761_p0) target bundleno = 134 (0x86), region = 36  ;;  %s300_s5 = sld [smem:[#allocation4 + %s2355_s12]] (%p2761_p0) }
  0x7b   : > { %s295_s30 = sand.u32 (%p2761_p0), 1, %s2199_s21   ;;  %s1832_s24 = smul.u32 (%p2761_p0), 12, %s2215_s25 }
  0x7c   : > { %s1517_s29 = sshll.u32 (%p2761_p0), %s295_s30, 5 }
  0x7d   : > { %s297_s13 = scalar_lea.vmem (%p2761_p0), [#allocation6], %s1517_s29 }
  0x80   : > { %s303_s15 = sadd.s32 (%p2761_p0), %s1832_s24, %s300_s5 }
  0x81   : > { %s1520_s28 = sshll.u32 %s303_s15, 3 }
  0x82   : > { %s305_s8 = scalar_lea.vmem %s2717_s2, %s1520_s28 }
  0x83   : > { %v339_v0 = vld [vmem:[%s305_s8] sm:$0xff]  ;;  %v341_v1 = vld [vmem:[%s305_s8 + $0x18] sm:$0xff]  ;;  %v343_v2 = vld [vmem:[%s305_s8 + $0x30] sm:$0xff] }
  0x84   : > { %340 = vst [vmem:[%s297_s13] sm:$0xff] %v339_v0  ;;  %342 = vst [vmem:[%s297_s13 + $0x8] sm:$0xff] %v341_v1  ;;  %v345_v3 = vld [vmem:[%s305_s8 + $0x48] sm:$0xff] }
  0x85   : > { %344 = vst [vmem:[%s297_s13 + $0x10] sm:$0xff] %v343_v2  ;;  %346 = vst [vmem:[%s297_s13 + $0x18] sm:$0xff] %v345_v3 }
  0x86 PF: > { %s353_s12 = sand.u32 1, %s2219_s26   ;;  %s355_s14 = sand.u32 1, %s2191_s19  }
  0x87   : > { %s1521_s16 = sshll.u32 %s355_s14, 6  ;;  %s1591_s17 = sshll.u32 %s2215_s25, 10 }
  0x88   : > { %s2479_s5 = scalar_lea.hbm %s2719_s4, %s1591_s17  ;;  %s357_s30 = scalar_lea.vmem [#allocation10], %s1521_s16 }
  0x89   : > { %s364_s24 = sshll.u32 %s357_s30, 4  ;;  %s2483_s29 = scalar_lea.sflag [#allocation11], %s353_s12  ;;  %s2481_s24 = int_to_ptr.vmem [resolvable:$true] %s364_s24 }
  0x8a   : > { %s2067_s15 = scalar_lea.hbm %s2479_s5, 1024  ;;  %p2762_p9 = scmp.ne.s32.totalorder %s2750_s0, 0 }
  0x8b   : > { %p2068_p2 = scmp.ne.s32.totalorder %s2479_s5, %s2067_s15  ;;  %s2071_s11 = scalar_lea.hbm %s2719_s4, 3072 }
  0x8c   : > { %p2072_p8 = scmp.lt.u32.totalorder %s2479_s5, %s2719_s4  ;;  %p2073_p12 = scmp.lt.u32.totalorder %s2071_s11, %s2067_s15 }
  0x8d   : > { %p2069_p4 = pnand %p2068_p2, %p2762_p9  ;;  %p2075_p6 = scmp.lt.u32.totalorder %s2067_s15, %s2479_s5 }
  0x8e   : > { %p2074_p13 = por %p2073_p12, %p2072_p8 }
  0x8f   : > { %p2070_p7 = pneg %p2069_p4 }
  0x90   : > { %p2076_p10 = por %p2075_p6, %p2074_p13 }
  0x92   : > { %p2077_p11 = pnand %p2076_p10, %p2070_p7 }
  0x94   : > { %2080 = shalt.err (!%p2077_p11)
}
  0x95   : > { %s2081_s12 = scalar_lea.vmem %s2481_s24, 1024  ;;  %s2227_s14 = smov [#allocation10]  }
  0x96   : > { %p2082_p1 = scmp.ne.s32.totalorder %s2481_s24, %s2081_s12  ;;  %s2085_s16 = sshll.u32 %s2227_s14, 4  ;;  %s2086_s16 = int_to_ptr.vmem [resolvable:$false] %s2085_s16 }
  0x97   : > { %s2087_s17 = scalar_lea.vmem %s2086_s16, 2048  ;;  %p2088_p0 = scmp.lt.s32.totalorder %s2481_s24, %s2086_s16 }
  0x98   : > { %p2083_p3 = pnand %p2082_p1, %p2762_p9  ;;  %p2089_p2 = scmp.lt.s32.totalorder %s2087_s17, %s2081_s12 }
  0x9a   : > { %p2084_p5 = pneg %p2083_p3  ;;  %p2090_p4 = por %p2089_p2, %p2088_p0 }
  0x9c   : > { %p2091_p8 = pnand %p2090_p4, %p2084_p5 }
  0x9e   : > { %2094 = shalt.err (!%p2091_p8)
}
  0x9f   : > { %s2228_s6 = smov 64   ;;  %s2229_s22 = smov 4  }
  0xa0   : > { %1837 = dma.hbm_to_vmem [thread:$0]  (%p2762_p9), %s2479_s5, 1024, %s2481_s24, %s2483_s29, %s2228_s6, %s2228_s6, %s2229_s22  }
  0xa1 PF: > { %p2763_p7 = scmp.ne.s32.totalorder %s2757_s10, 0 }
  0xa2   : > { %s388_s30 = sand.u32 (!%p2763_p7), 1, %s2195_s20   ;;  %p2764_p12 = scmp.eq.s32.totalorder (!%p2763_p7), %s2342_s27, 0 }
  0xa3   : > { %385 = sbr.rel (%p2763_p7) target bundleno = 903 (0x387), region = 82  ;;  %s1525_s15 = sshll.u32 (!%p2763_p7), %s388_s30, 5 }
  0xa4   : > { %s2510_s28 = scalar_lea.vmem (!%p2763_p7), [#allocation6], %s1525_s15 }
  0xaa   : > { %2166 = dma.done.wait (%p2764_p12), [#allocation8], 3072   ;;  %p2765_p13 = pmov %p2764_p12 }
  0xab   : > { %s398_s0 = sand.u32 1, %s2342_s27   ;;  %s400_s5 = sand.u32 1, %s2187_s18  }
  0xac   : > { %2168 = vsyncadd (%p2765_p13), [#allocation8], 4294964224  ;;  %s1527_s10 = sshll.u32 %s400_s5, 6  ;;  %s399_s24 = scalar_lea.sflag [#allocation11], %s398_s0 }
  0xad   : > { %s2520_s29 = scalar_lea.vmem [#allocation10], %s1527_s10  ;;  %p2766_p9 = scmp.ne.s32.totalorder %s2752_s9, 0 }
  0xaf   : > { %2170 = dma.done.wait (%p2766_p9), %s399_s24, 1024  }
  0xb0   : > { %2172 = vsyncadd (%p2766_p9), %s399_s24, 4294966272  ;;  %p2767_p6 = pmov %p2764_p12 }
  0xb2   : > { %2174 = dma.done.wait (%p2767_p6), [#allocation11], 1024   ;;  %p2768_p10 = pmov %p2767_p6 }
  0xb3   : > { %s1530_s20 = sshll.u32 %s2207_s23, 4  ;;  %s2769_s13 = sld [smem:[#allocation28_spill]] }
  0xb4   : > { %2176 = vsyncadd (%p2768_p10), [#allocation11], 4294966272  ;;  %p452_p11 = scmp.lt.s32.totalorder %s1530_s20, 47  ;;  %s2536_s14 = scalar_lea.vmem [#allocation13], %s1527_s10 }
  0xb5   : > { %s2770_s9 = sld [smem:[#allocation20_spill]] }
  0xb6   : > { %s2802_s20 = smov (!%p452_p11, %s1530_s20), 47 }
  0xb7   : > { %s1531_s1 = sshll.u32 %s2802_s20, 3 }
  0xb9   : > { %s2534_s12 = scalar_lea.vmem %s2769_s13, %s1531_s1 }
  0xbb   : > { %p1532_p1 = scmp.ne.s32.totalorder %s2770_s9, 0 }
  0xbc   : > { %v2230_v4 = vmov (!%p1532_p1), 0.0  }
  0xbd   : > { %462 = sbr.rel (%p1532_p1) target bundleno = 197 (0xc5), region = 102  ;;  %463 = vst [vmem:[#allocation2] sm:$0xff] (!%p1532_p1), %v2230_v4  ;;  %464 = vst [vmem:[#allocation2 + $0x8] sm:$0xff] (!%p1532_p1), %v2230_v4 }
  0xbe   : > { %465 = vst [vmem:[#allocation2 + $0x10] sm:$0xff] (!%p1532_p1), %v2230_v4  ;;  %466 = vst [vmem:[#allocation2 + $0x18] sm:$0xff] (!%p1532_p1), %v2230_v4 }
  0xbf   : > { %467 = vst [vmem:[#allocation2 + $0x20] sm:$0xff] (!%p1532_p1), %v2230_v4  ;;  %468 = vst [vmem:[#allocation2 + $0x28] sm:$0xff] (!%p1532_p1), %v2230_v4 }
  0xc0   : > { %469 = vst [vmem:[#allocation2 + $0x30] sm:$0xff] (!%p1532_p1), %v2230_v4  ;;  %470 = vst [vmem:[#allocation2 + $0x38] sm:$0xff] (!%p1532_p1), %v2230_v4 }
  0xc1   : > { %471 = vst [vmem:[#allocation2 + $0x40] sm:$0xff] (!%p1532_p1), %v2230_v4  ;;  %472 = vst [vmem:[#allocation2 + $0x48] sm:$0xff] (!%p1532_p1), %v2230_v4 }
  0xc2   : > { %473 = vst [vmem:[#allocation2 + $0x50] sm:$0xff] (!%p1532_p1), %v2230_v4  ;;  %474 = vst [vmem:[#allocation2 + $0x58] sm:$0xff] (!%p1532_p1), %v2230_v4 }
  0xc3   : > { %475 = vst [vmem:[#allocation2 + $0x60] sm:$0xff] (!%p1532_p1), %v2230_v4  ;;  %476 = vst [vmem:[#allocation2 + $0x68] sm:$0xff] (!%p1532_p1), %v2230_v4 }
  0xc4   : > { %477 = vst [vmem:[#allocation2 + $0x70] sm:$0xff] %v2230_v4  ;;  %478 = vst [vmem:[#allocation2 + $0x78] sm:$0xff] %v2230_v4 }
  0xc5 PF: > { %s479_s27 = sld [smem:[#allocation5 + %s2207_s23]] }
  0xc6   : > { %s2771_s16 = sld [smem:[#allocation20_spill]] }
  0xcc   : > { %p1533_p3 = scmp.ge.s32.totalorder %s2771_s16, %s479_s27 }
  0xcd   : > { %s2772_s17 = sld [smem:[#allocation20_spill]] (!%p1533_p3)  ;;  %s496_s6 = smul.u32 (!%p1533_p3), 3, %s2207_s23  ;;  %v484_v5 = vld [vmem:[%s2510_s28] sm:$0xff] (!%p1533_p3)  ;;  %v486_v6 = vld [vmem:[%s2510_s28 + $0x10] sm:$0xff] (!%p1533_p3)  ;;  %v485_v17 = vld [vmem:[%s2510_s28 + $0x8] sm:$0xff] (!%p1533_p3) }
  0xce   : > { %483 = sbr.rel (%p1533_p3) target bundleno = 481 (0x1e1), region = 106  ;;  %v488_v7 = vunpack.c.l.s8.bf16 (!%p1533_p3), %v484_v5  ;;  %v492_v8 = vunpack.c.l.s8.bf16 (!%p1533_p3), %v486_v6  ;;  %v487_v18 = vld [vmem:[%s2510_s28 + $0x18] sm:$0xff] (!%p1533_p3)  ;;  %v489_v19 = vunpack.c.h.s8.bf16 (!%p1533_p3), %v484_v5  ;;  %v493_v20 = vunpack.c.h.s8.bf16 (!%p1533_p3), %v486_v6  ;;  %v522_v25 = vld [vmem:[#allocation2 + $0x10] sm:$0xff] (!%p1533_p3)  ;;  %v520_v27 = vld [vmem:[#allocation2] sm:$0xff] (!%p1533_p3) }
  0xcf   : > { %v490_v21 = vunpack.c.l.s8.bf16 (!%p1533_p3), %v485_v17  ;;  %v494_v22 = vunpack.c.l.s8.bf16 (!%p1533_p3), %v487_v18  ;;  %v491_v23 = vunpack.c.h.s8.bf16 (!%p1533_p3), %v485_v17  ;;  %v495_v24 = vunpack.c.h.s8.bf16 (!%p1533_p3), %v487_v18  ;;  %v530_v26 = vld [vmem:[#allocation2 + $0x50] sm:$0xff] (!%p1533_p3)  ;;  %v528_v28 = vld [vmem:[#allocation2 + $0x40] sm:$0xff] (!%p1533_p3)  ;;  %v523_v31 = vld [vmem:[#allocation2 + $0x18] sm:$0xff] (!%p1533_p3) }
  0xd0   : > { %1720 = vmatprep.mubr.bf16.mxu0 (!%p1533_p3), %v488_v7  ;;  %1728 = vmatprep.mubr.bf16.mxu1 (!%p1533_p3), %v492_v8  ;;  %v531_v32 = vld [vmem:[#allocation2 + $0x58] sm:$0xff] (!%p1533_p3)  ;;  %v521_v37 = vld [vmem:[#allocation2 + $0x8] sm:$0xff] (!%p1533_p3)  ;;  %v526_v49 = vld [vmem:[#allocation2 + $0x30] sm:$0xff] (!%p1533_p3) }
  0xd1   : > { %v529_v38 = vld [vmem:[#allocation2 + $0x48] sm:$0xff] (!%p1533_p3)  ;;  %v534_v50 = vld [vmem:[#allocation2 + $0x70] sm:$0xff] (!%p1533_p3)  ;;  %v524_v51 = vld [vmem:[#allocation2 + $0x20] sm:$0xff] (!%p1533_p3) }
  0xd2   : > { %v532_v52 = vld [vmem:[#allocation2 + $0x60] sm:$0xff] (!%p1533_p3)  ;;  %v527_v55 = vld [vmem:[#allocation2 + $0x38] sm:$0xff] (!%p1533_p3)  ;;  %v525_v61 = vld [vmem:[#allocation2 + $0x28] sm:$0xff] (!%p1533_p3) }
  0xd3   : > { %s497_s22 = sadd.s32 (!%p1533_p3), %s2772_s17, %s496_s6  ;;  %v535_v56 = vld [vmem:[#allocation2 + $0x78] sm:$0xff] (!%p1533_p3)  ;;  %v533_v62 = vld [vmem:[#allocation2 + $0x68] sm:$0xff] (!%p1533_p3) }
  0xd4   : > { %s498_s30 = sld [smem:[#allocation4 + %s497_s22]] (!%p1533_p3) }
  0xda   : > { %s1534_s15 = sshll.u32 %s498_s30, 7 }
  0xdb   : > { %s500_s0 = sshra.s32 %s1534_s15, 3 }
  0xdc   : > { %s1535_s10 = sshll.u32 %s500_s0, 2 }
  0xdd   : > { %s2545_s24 = scalar_lea.vmem [#allocation7], %s1535_s10 }
  0xde   : > { %v1953_v9 = vld [vmem:[%s2545_s24] sm:$0xff]   ;;  %v1954_v10 = vld [vmem:[%s2545_s24 + $0x8] sm:$0xff]   ;;  %v1955_v11 = vld [vmem:[%s2545_s24 + $0x10] sm:$0xff]  }
  0xdf   : > { %1704 = vmatprep.subr.bf16.mxu0 %v1953_v9  ;;  %1800 = vmatprep.subr.bf16.mxu1 %v1953_v9  ;;  %v1956_v12 = vld [vmem:[%s2545_s24 + $0x18] sm:$0xff]   ;;  %v1957_v13 = vld [vmem:[%s2545_s24 + $0x20] sm:$0xff]   ;;  %v1958_v14 = vld [vmem:[%s2545_s24 + $0x28] sm:$0xff]  }
  0xe0   : > { %1705 = vmatpush3.bf16.msra.mxu0 %v1953_v9  ;;  %1808 = vmatpush3.bf16.msra.mxu1 %v1953_v9  ;;  %v1959_v15 = vld [vmem:[%s2545_s24 + $0x30] sm:$0xff]   ;;  %v1960_v16 = vld [vmem:[%s2545_s24 + $0x38] sm:$0xff]  }
  0xe1   : > { %1706 = vmatprep.subr.bf16.mxu0 %v1954_v10  ;;  %1801 = vmatprep.subr.bf16.mxu1 %v1954_v10 }
  0xe4   : > { %1707 = vmatpush3.bf16.msra.mxu0 %v1954_v10  ;;  %1809 = vmatpush3.bf16.msra.mxu1 %v1954_v10 }
  0xe5   : > { %1708 = vmatprep.subr.bf16.mxu0 %v1955_v11  ;;  %1802 = vmatprep.subr.bf16.mxu1 %v1955_v11 }
  0xe8   : > { %1709 = vmatpush3.bf16.msra.mxu0 %v1955_v11  ;;  %1810 = vmatpush3.bf16.msra.mxu1 %v1955_v11 }
  0xe9   : > { %1710 = vmatprep.subr.bf16.mxu0 %v1956_v12  ;;  %1803 = vmatprep.subr.bf16.mxu1 %v1956_v12 }
  0xec   : > { %1711 = vmatpush3.bf16.msra.mxu0 %v1956_v12  ;;  %1811 = vmatpush3.bf16.msra.mxu1 %v1956_v12 }
  0xed   : > { %1712 = vmatprep.subr.bf16.mxu0 %v1957_v13  ;;  %1804 = vmatprep.subr.bf16.mxu1 %v1957_v13 }
  0xf0   : > { %1713 = vmatpush3.bf16.msra.mxu0 %v1957_v13  ;;  %1812 = vmatpush3.bf16.msra.mxu1 %v1957_v13 }
  0xf1   : > { %1714 = vmatprep.subr.bf16.mxu0 %v1958_v14  ;;  %1805 = vmatprep.subr.bf16.mxu1 %v1958_v14 }
  0xf4   : > { %1715 = vmatpush3.bf16.msra.mxu0 %v1958_v14  ;;  %1813 = vmatpush3.bf16.msra.mxu1 %v1958_v14 }
  0xf5   : > { %1716 = vmatprep.subr.bf16.mxu0 %v1959_v15  ;;  %1806 = vmatprep.subr.bf16.mxu1 %v1959_v15 }
  0xf8   : > { %1717 = vmatpush3.bf16.msra.mxu0 %v1959_v15  ;;  %1814 = vmatpush3.bf16.msra.mxu1 %v1959_v15 }
  0xf9   : > { %1718 = vmatprep.subr.bf16.mxu0 %v1960_v16  ;;  %1807 = vmatprep.subr.bf16.mxu1 %v1960_v16 }
  0xfc   : > { %1719 = vmatpush3.bf16.msra.mxu0 %v1960_v16  ;;  %1815 = vmatpush3.bf16.msra.mxu1 %v1960_v16 }
  0xff   : > { %1721 = vmatmul.mubr.bf16.vlgmr.msra.gmra.mrb[0].mxu0 %v489_v19  ;;  %1729 = vmatmul.mubr.bf16.vlgmr.msra.gmra.mrb[0].mxu1 %v493_v20 }
 0x100   : > { %1724 = vmatprep.mubr.bf16.mxu0 %v490_v21  ;;  %1732 = vmatprep.mubr.bf16.mxu1 %v494_v22 }
 0x107   : > { %1725 = vmatmul.mubr.bf16.gmra.mrb[4].mxu0 %v491_v23  ;;  %1733 = vmatmul.mubr.bf16.gmra.mrb[4].mxu1 %v495_v24 }
 0x1d2   : > { %v1722_v29 = vpop.f32.mrb[0].mxu0  ;;  %v1730_v30 = vpop.f32.mrb[0].mxu1 }
 0x1d3   : > { %v683_v33 = vadd.f32 %v1722_v29, %v522_v25  ;;  %v691_v34 = vadd.f32 %v1730_v30, %v530_v26  ;;  %v618_v35 = vpop.f32.mrb[1].mxu0  ;;  %v650_v36 = vpop.f32.mrb[1].mxu1 }
 0x1d4   : > { %v681_v39 = vadd.f32 %v618_v35, %v520_v27  ;;  %v689_v40 = vadd.f32 %v650_v36, %v528_v28  ;;  %v1723_v41 = vpop.f32.mrb[2].mxu0  ;;  %v1731_v42 = vpop.f32.mrb[2].mxu1 }
 0x1d5   : > { %699 = vst [vmem:[#allocation2 + $0x10] sm:$0xff] %v683_v33  ;;  %707 = vst [vmem:[#allocation2 + $0x50] sm:$0xff] %v691_v34  ;;  %v684_v43 = vadd.f32 %v1723_v41, %v523_v31  ;;  %v692_v44 = vadd.f32 %v1731_v42, %v531_v32  ;;  %v621_v45 = vpop.f32.mrb[3].mxu0  ;;  %v653_v46 = vpop.f32.mrb[3].mxu1 }
 0x1d6   : > { %697 = vst [vmem:[#allocation2] sm:$0xff] %v681_v39  ;;  %705 = vst [vmem:[#allocation2 + $0x40] sm:$0xff] %v689_v40  ;;  %v682_v47 = vadd.f32 %v621_v45, %v521_v37  ;;  %v690_v48 = vadd.f32 %v653_v46, %v529_v38 }
 0x1d7   : > { %700 = vst [vmem:[#allocation2 + $0x18] sm:$0xff] %v684_v43  ;;  %708 = vst [vmem:[#allocation2 + $0x58] sm:$0xff] %v692_v44 }
 0x1d8   : > { %698 = vst [vmem:[#allocation2 + $0x8] sm:$0xff] %v682_v47  ;;  %706 = vst [vmem:[#allocation2 + $0x48] sm:$0xff] %v690_v48 }
 0x1da   : > { %v1726_v53 = vpop.f32.mrb[4].mxu0  ;;  %v1734_v54 = vpop.f32.mrb[4].mxu1 }
 0x1db   : > { %v687_v57 = vadd.f32 %v1726_v53, %v526_v49  ;;  %v695_v58 = vadd.f32 %v1734_v54, %v534_v50  ;;  %v634_v59 = vpop.f32.mrb[5].mxu0  ;;  %v666_v60 = vpop.f32.mrb[5].mxu1 }
 0x1dc   : > { %v685_v63 = vadd.f32 %v634_v59, %v524_v51  ;;  %v693_v0 = vadd.f32 %v666_v60, %v532_v52  ;;  %v1727_v1 = vpop.f32.mrb[6].mxu0  ;;  %v1735_v2 = vpop.f32.mrb[6].mxu1 }
 0x1dd   : > { %703 = vst [vmem:[#allocation2 + $0x30] sm:$0xff] %v687_v57  ;;  %711 = vst [vmem:[#allocation2 + $0x70] sm:$0xff] %v695_v58  ;;  %v688_v3 = vadd.f32 %v1727_v1, %v527_v55  ;;  %v696_v4 = vadd.f32 %v1735_v2, %v535_v56  ;;  %v637_v5 = vpop.f32.mrb[7].mxu0  ;;  %v669_v6 = vpop.f32.mrb[7].mxu1 }
 0x1de   : > { %701 = vst [vmem:[#allocation2 + $0x20] sm:$0xff] %v685_v63  ;;  %709 = vst [vmem:[#allocation2 + $0x60] sm:$0xff] %v693_v0  ;;  %v686_v7 = vadd.f32 %v637_v5, %v525_v61  ;;  %v694_v8 = vadd.f32 %v669_v6, %v533_v62 }
 0x1df   : > { %704 = vst [vmem:[#allocation2 + $0x38] sm:$0xff] %v688_v3  ;;  %712 = vst [vmem:[#allocation2 + $0x78] sm:$0xff] %v696_v4 }
 0x1e0   : > { %702 = vst [vmem:[#allocation2 + $0x28] sm:$0xff] %v686_v7  ;;  %710 = vst [vmem:[#allocation2 + $0x68] sm:$0xff] %v694_v8 }
 0x1e1 PF: > { %s2773_s28 = sld [smem:[#allocation20_spill]] }
 0x1e7   : > { %p1544_p5 = scmp.ne.s32.totalorder %s2773_s28, 2 }
 0x1e8   : > { %v735_v9 = vld [vmem:[%s2534_s12 + $0x10] sm:$0xff] (!%p1544_p5)  ;;  %v733_v10 = vld [vmem:[%s2534_s12] sm:$0xff] (!%p1544_p5)  ;;  %v2231_v11 = vmov (!%p1544_p5), 0   ;;  %v736_v12 = vld [vmem:[%s2534_s12 + $0x18] sm:$0xff] (!%p1544_p5)  ;;  %s2774_s11 = sld [smem:[#allocation29_spill]] (!%p1544_p5)  ;;  %s2775_s20 = sld [smem:[#allocation30_spill]] (!%p1544_p5) }
 0x1e9   : > { %716 = sbr.rel (%p1544_p5) target bundleno = 875 (0x36b), region = 110  ;;  %1962 = vset.pattern.permute.xlu1 (!%p1544_p5), %v2231_v11  ;;  %1961 = vset.pattern.permute.xlu0 (!%p1544_p5), %v2231_v11  ;;  %v734_v13 = vld [vmem:[%s2534_s12 + $0x8] sm:$0xff] (!%p1544_p5)  ;;  %v737_v15 = vld [vmem:[%s2534_s12 + $0x20] sm:$0xff] (!%p1544_p5)  ;;  %v740_v19 = vld [vmem:[%s2534_s12 + $0x38] sm:$0xff] (!%p1544_p5) }
 0x1ea   : > { %761 = vperm.xlu1 (!%p1544_p5), %1962, %v735_v9   ;;  %751 = vperm.xlu0 (!%p1544_p5), %1961, %v733_v10   ;;  %v738_v14 = vld [vmem:[%s2534_s12 + $0x28] sm:$0xff] (!%p1544_p5)  ;;  %v1964_v17 = vld [vmem:[#allocation12] sm:$0xff] (!%p1544_p5)   ;;  %v739_v21 = vld [vmem:[%s2534_s12 + $0x30] sm:$0xff] (!%p1544_p5) }
 0x1eb   : > { %1736 = vmatprep.subr.bf16.mxu1 (!%p1544_p5), %v1964_v17  ;;  %v1966_v20 = vld [vmem:[#allocation12 + $0x8] sm:$0xff] (!%p1544_p5)   ;;  %v1968_v23 = vld [vmem:[#allocation12 + $0x10] sm:$0xff] (!%p1544_p5)   ;;  %v741_v25 = vld [vmem:[%s2534_s12 + $0x40] sm:$0xff] (!%p1544_p5) }
 0x1ec   : > { %1737 = vmatpush3.bf16.msra.mxu1 (!%p1544_p5), %v1964_v17  ;;  %v742_v24 = vld [vmem:[%s2534_s12 + $0x48] sm:$0xff] (!%p1544_p5)  ;;  %v1970_v27 = vld [vmem:[#allocation12 + $0x18] sm:$0xff] (!%p1544_p5)   ;;  %v743_v29 = vld [vmem:[%s2534_s12 + $0x50] sm:$0xff] (!%p1544_p5) }
 0x1ed   : > { %1738 = vmatprep.subr.bf16.mxu1 (!%p1544_p5), %v1966_v20  ;;  %v744_v28 = vld [vmem:[%s2534_s12 + $0x58] sm:$0xff] (!%p1544_p5)  ;;  %v1972_v31 = vld [vmem:[#allocation12 + $0x20] sm:$0xff] (!%p1544_p5)   ;;  %v746_v32 = vld [vmem:[%s2534_s12 + $0x68] sm:$0xff] (!%p1544_p5) }
 0x1ee   : > { %766 = vperm.xlu1 (!%p1544_p5), %1962, %v736_v12   ;;  %756 = vperm.xlu0 (!%p1544_p5), %1961, %v734_v13   ;;  %v1963_v16 = vld [vmem:[%s2774_s11] sm:$0xff] (!%p1544_p5)   ;;  %v1965_v18 = vld [vmem:[%s2774_s11 + $0x8] sm:$0xff] (!%p1544_p5)   ;;  %v1967_v22 = vld [vmem:[%s2774_s11 + $0x10] sm:$0xff] (!%p1544_p5)  }
 0x1ef   : > { %1768 = vmatprep.subr.bf16.mxu0 (!%p1544_p5), %v1963_v16  ;;  %v1969_v26 = vld [vmem:[%s2774_s11 + $0x18] sm:$0xff] (!%p1544_p5)   ;;  %v1971_v30 = vld [vmem:[%s2774_s11 + $0x20] sm:$0xff] (!%p1544_p5)   ;;  %v1973_v34 = vld [vmem:[%s2774_s11 + $0x28] sm:$0xff] (!%p1544_p5)  }
 0x1f0   : > { %1769 = vmatpush3.bf16.msra.mxu0 %v1963_v16  ;;  %1739 = vmatpush3.bf16.msra.mxu1 %v1966_v20  ;;  %v745_v33 = vld [vmem:[%s2534_s12 + $0x60] sm:$0xff]  ;;  %v1974_v36 = vld [vmem:[#allocation12 + $0x28] sm:$0xff]   ;;  %v748_v37 = vld [vmem:[%s2534_s12 + $0x78] sm:$0xff] }
 0x1f1   : > { %1770 = vmatprep.subr.bf16.mxu0 %v1965_v18  ;;  %1740 = vmatprep.subr.bf16.mxu1 %v1968_v23  ;;  %v1979_v35 = vld [vmem:[%s2520_s29] sm:$0xff]   ;;  %v747_v38 = vld [vmem:[%s2534_s12 + $0x70] sm:$0xff]  ;;  %v1977_v41 = vld [vmem:[%s2774_s11 + $0x38] sm:$0xff]  }
 0x1f2   : > { %776 = vperm.xlu1 %1962, %v738_v14   ;;  %771 = vperm.xlu0 %1961, %v737_v15   ;;  %v1975_v39 = vld [vmem:[%s2774_s11 + $0x30] sm:$0xff]   ;;  %v1978_v42 = vld [vmem:[#allocation12 + $0x38] sm:$0xff]   ;;  %v1980_v43 = vld [vmem:[%s2520_s29 + $0x8] sm:$0xff]  }
 0x1f3   : > { %1784 = vmatprep.mubr.bf16.mxu0 %v1979_v35  ;;  %v1976_v40 = vld [vmem:[#allocation12 + $0x30] sm:$0xff]   ;;  %v1982_v45 = vld [vmem:[%s2520_s29 + $0x18] sm:$0xff]   ;;  %v1983_v46 = vld [vmem:[%s2520_s29 + $0x20] sm:$0xff]  }
 0x1f4   : > { %1771 = vmatpush3.bf16.msra.mxu0 %v1965_v18  ;;  %1741 = vmatpush3.bf16.msra.mxu1 %v1968_v23  ;;  %v1981_v44 = vld [vmem:[%s2520_s29 + $0x10] sm:$0xff]   ;;  %v1984_v47 = vld [vmem:[%s2520_s29 + $0x28] sm:$0xff]   ;;  %v1986_v49 = vld [vmem:[%s2520_s29 + $0x38] sm:$0xff]  }
 0x1f5   : > { %1772 = vmatprep.subr.bf16.mxu0 %v1967_v22  ;;  %1742 = vmatprep.subr.bf16.mxu1 %v1970_v27  ;;  %v1985_v48 = vld [vmem:[%s2520_s29 + $0x30] sm:$0xff]   ;;  %v717_v53 = vld [vmem:[#allocation2] sm:$0xff]  ;;  %v720_v54 = vld [vmem:[#allocation2 + $0x18] sm:$0xff] }
 0x1f6   : > { %786 = vperm.xlu1 %1962, %v740_v19   ;;  %781 = vperm.xlu0 %1961, %v739_v21   ;;  %v719_v52 = vld [vmem:[#allocation2 + $0x10] sm:$0xff]  ;;  %v718_v55 = vld [vmem:[#allocation2 + $0x8] sm:$0xff]  ;;  %v721_v63 = vld [vmem:[#allocation2 + $0x20] sm:$0xff] }
 0x1f7   : > { %v722_v62 = vld [vmem:[#allocation2 + $0x28] sm:$0xff]  ;;  %v724_v6 = vld [vmem:[#allocation2 + $0x38] sm:$0xff]  ;;  %v723_v7 = vld [vmem:[#allocation2 + $0x30] sm:$0xff] }
 0x1f8   : > { %1773 = vmatpush3.bf16.msra.mxu0 %v1967_v22  ;;  %1743 = vmatpush3.bf16.msra.mxu1 %v1970_v27  ;;  %v726_v13 = vld [vmem:[#allocation2 + $0x48] sm:$0xff]  ;;  %v725_v14 = vld [vmem:[#allocation2 + $0x40] sm:$0xff]  ;;  %v728_v20 = vld [vmem:[#allocation2 + $0x58] sm:$0xff] }
 0x1f9   : > { %1774 = vmatprep.subr.bf16.mxu0 %v1969_v26  ;;  %1744 = vmatprep.subr.bf16.mxu1 %v1972_v31  ;;  %v727_v21 = vld [vmem:[#allocation2 + $0x50] sm:$0xff]  ;;  %v730_v27 = vld [vmem:[#allocation2 + $0x68] sm:$0xff] }
 0x1fa   : > { %796 = vperm.xlu1 %1962, %v742_v24   ;;  %791 = vperm.xlu0 %1961, %v741_v25   ;;  %v731_v35 = vld [vmem:[#allocation2 + $0x70] sm:$0xff] }
 0x1fc   : > { %1775 = vmatpush3.bf16.msra.mxu0 %v1969_v26  ;;  %1745 = vmatpush3.bf16.msra.mxu1 %v1972_v31 }
 0x1fd   : > { %1776 = vmatprep.subr.bf16.mxu0 %v1971_v30  ;;  %1746 = vmatprep.subr.bf16.mxu1 %v1974_v36 }
 0x1fe   : > { %806 = vperm.xlu1 %1962, %v744_v28   ;;  %801 = vperm.xlu0 %1961, %v743_v29   ;;  %v729_v28 = vld [vmem:[#allocation2 + $0x60] sm:$0xff] }
 0x200   : > { %1777 = vmatpush3.bf16.msra.mxu0 %v1971_v30  ;;  %1747 = vmatpush3.bf16.msra.mxu1 %v1974_v36 }
 0x201   : > { %1778 = vmatprep.subr.bf16.mxu0 %v1973_v34  ;;  %1748 = vmatprep.subr.bf16.mxu1 %v1976_v40 }
 0x202   : > { %816 = vperm.xlu1 %1962, %v746_v32   ;;  %811 = vperm.xlu0 %1961, %v745_v33  }
 0x204   : > { %1779 = vmatpush3.bf16.msra.mxu0 %v1973_v34  ;;  %1749 = vmatpush3.bf16.msra.mxu1 %v1976_v40  ;;  %v732_v34 = vld [vmem:[#allocation2 + $0x78] sm:$0xff] }
 0x205   : > { %1780 = vmatprep.subr.bf16.mxu0 %v1975_v39  ;;  %1750 = vmatprep.subr.bf16.mxu1 %v1978_v42 }
 0x206   : > { %826 = vperm.xlu1 %1962, %v748_v37   ;;  %821 = vperm.xlu0 %1961, %v747_v38  }
 0x208   : > { %1781 = vmatpush3.bf16.msra.mxu0 %v1975_v39  ;;  %1751 = vmatpush3.bf16.msra.mxu1 %v1978_v42 }
 0x209   : > { %1782 = vmatprep.subr.bf16.mxu0 %v1977_v41 }
 0x20c   : > { %1783 = vmatpush3.bf16.msra.mxu0 %v1977_v41 }
 0x20f   : > { %1785 = vmatmul.mubr.bf16.vlgmr.msra.gmra.mrb[0].mxu0 %v1980_v43 }
 0x210   : > { %1788 = vmatprep.mubr.bf16.mxu0 %v1981_v44 }
 0x217   : > { %1789 = vmatmul.mubr.bf16.gmra.mrb[4].mxu0 %v1982_v45 }
 0x218   : > { %1792 = vmatprep.mubr.bf16.mxu0 %v1983_v46 }
 0x21f   : > { %1793 = vmatmul.mubr.bf16.gmra.mrb[8].mxu0 %v1984_v47 }
 0x220   : > { %1796 = vmatprep.mubr.bf16.mxu0 %v1985_v48 }
 0x227   : > { %1797 = vmatmul.mubr.bf16.gmra.mrb[12].mxu0 %v1986_v49 }
 0x269   : > { %v762_v50 = vpop.permute.xlu1 %761  ;;  %v752_v51 = vpop.permute.xlu0 %751 }
 0x26a   : > { %v831_v58 = vmul.f32 %v762_v50, %v719_v52  ;;  %v829_v59 = vmul.f32 %v752_v51, %v717_v53 }
 0x26d   : > { %v767_v56 = vpop.permute.xlu1 %766  ;;  %v757_v57 = vpop.permute.xlu0 %756 }
 0x26e   : > { %v832_v60 = vmul.f32 %v767_v56, %v720_v54  ;;  %v830_v61 = vmul.f32 %v757_v57, %v718_v55 }
 0x270   : > { %v846_v0 = vpack.c.bf16 %v832_v60, %v831_v58  ;;  %v845_v1 = vpack.c.bf16 %v830_v61, %v829_v59  ;;  %v2617_v59 = vld [vmem:[%s2775_s20] ss:$0 sm:$0xff] }
 0x271   : > { %v777_v2 = vpop.permute.xlu1 %776  ;;  %v772_v3 = vpop.permute.xlu0 %771 }
 0x272   : > { %v834_v4 = vmul.f32 %v777_v2, %v722_v62  ;;  %v833_v5 = vmul.f32 %v772_v3, %v721_v63  ;;  %1752 = vmatprep.mubr.bf16.mxu1 %v845_v1 }
 0x273   : > { %1753 = vmatmul.mubr.bf16.vlgmr.msra.gmra.mrb[0].mxu1 %v846_v0 }
 0x274   : > { %v847_v8 = vpack.c.bf16 %v834_v4, %v833_v5 }
 0x275   : > { %v787_v9 = vpop.permute.xlu1 %786  ;;  %v782_v10 = vpop.permute.xlu0 %781 }
 0x276   : > { %v836_v11 = vmul.f32 %v787_v9, %v724_v6  ;;  %v835_v12 = vmul.f32 %v782_v10, %v723_v7  ;;  %1756 = vmatprep.mubr.bf16.mxu1 %v847_v8 }
 0x278   : > { %v848_v15 = vpack.c.bf16 %v836_v11, %v835_v12 }
 0x279   : > { %v797_v16 = vpop.permute.xlu1 %796  ;;  %v792_v17 = vpop.permute.xlu0 %791 }
 0x27a   : > { %v838_v18 = vmul.f32 %v797_v16, %v726_v13  ;;  %v837_v19 = vmul.f32 %v792_v17, %v725_v14 }
 0x27b   : > { %1757 = vmatmul.mubr.bf16.gmra.mrb[4].mxu1 %v848_v15 }
 0x27c   : > { %v849_v22 = vpack.c.bf16 %v838_v18, %v837_v19 }
 0x27d   : > { %v807_v23 = vpop.permute.xlu1 %806  ;;  %v802_v24 = vpop.permute.xlu0 %801 }
 0x27e   : > { %v840_v25 = vmul.f32 %v807_v23, %v728_v20  ;;  %v839_v26 = vmul.f32 %v802_v24, %v727_v21  ;;  %1760 = vmatprep.mubr.bf16.mxu1 %v849_v22 }
 0x280   : > { %v850_v29 = vpack.c.bf16 %v840_v25, %v839_v26 }
 0x281   : > { %v817_v30 = vpop.permute.xlu1 %816  ;;  %v812_v31 = vpop.permute.xlu0 %811 }
 0x282   : > { %v842_v32 = vmul.f32 %v817_v30, %v730_v27  ;;  %v841_v33 = vmul.f32 %v812_v31, %v729_v28 }
 0x283   : > { %1761 = vmatmul.mubr.bf16.gmra.mrb[8].mxu1 %v850_v29 }
 0x284   : > { %v851_v36 = vpack.c.bf16 %v842_v32, %v841_v33 }
 0x285   : > { %v827_v37 = vpop.permute.xlu1 %826  ;;  %v822_v38 = vpop.permute.xlu0 %821 }
 0x286   : > { %v844_v39 = vmul.f32 %v827_v37, %v732_v34  ;;  %v843_v40 = vmul.f32 %v822_v38, %v731_v35  ;;  %1764 = vmatprep.mubr.bf16.mxu1 %v851_v36 }
 0x288   : > { %v852_v41 = vpack.c.bf16 %v844_v39, %v843_v40 }
 0x28b   : > { %1765 = vmatmul.mubr.bf16.gmra.mrb[12].mxu1 %v852_v41 }
 0x2e2   : > { %v1786_v42 = vpop.f32.mrb[0].mxu0 }
 0x2e3   : > { %v1176_v43 = vpop.f32.mrb[1].mxu0 }
 0x2e4   : > { %v1787_v44 = vpop.f32.mrb[2].mxu0 }
 0x2e5   : > { %v1179_v45 = vpop.f32.mrb[3].mxu0 }
 0x2ea   : > { %v1790_v46 = vpop.f32.mrb[4].mxu0 }
 0x2eb   : > { %v1192_v47 = vpop.f32.mrb[5].mxu0 }
 0x2ec   : > { %v1791_v48 = vpop.f32.mrb[6].mxu0 }
 0x2ed   : > { %v1195_v49 = vpop.f32.mrb[7].mxu0 }
 0x2f2   : > { %v1794_v50 = vpop.f32.mrb[8].mxu0 }
 0x2f3   : > { %v1208_v51 = vpop.f32.mrb[9].mxu0 }
 0x2f4   : > { %v1795_v52 = vpop.f32.mrb[10].mxu0 }
 0x2f5   : > { %v1211_v53 = vpop.f32.mrb[11].mxu0 }
 0x2fa   : > { %v2606_v54 = vpop.f32.mrb[12].mxu0 }
 0x2fb   : > { %v2608_v55 = vpop.f32.mrb[13].mxu0 }
 0x2fc   : > { %v2610_v56 = vpop.f32.mrb[14].mxu0 }
 0x2fd   : > { %v2612_v57 = vpop.f32.mrb[15].mxu0 }
 0x346   : > { %v1754_v58 = vpop.f32.mrb[0].mxu1 }
 0x347   : > { %v1185_v60 = vadd.f32 %v1786_v42, %v1754_v58  ;;  %v983_v61 = vpop.f32.mrb[1].mxu1 }
 0x348   : > { %v1177_v62 = vadd.f32 %v1176_v43, %v983_v61  ;;  %v1755_v63 = vpop.f32.mrb[2].mxu1 }
 0x349   : > { %v1248_v0 = vadd.f32 %v2617_v59, %v1185_v60  ;;  %v1188_v1 = vadd.f32 %v1787_v44, %v1755_v63  ;;  %v986_v2 = vpop.f32.mrb[3].mxu1 }
 0x34a   : > { %v1246_v3 = vadd.f32 %v2617_v59, %v1177_v62  ;;  %v1180_v4 = vadd.f32 %v1179_v45, %v986_v2 }
 0x34b   : > { %v1249_v5 = vadd.f32 %v2617_v59, %v1188_v1  ;;  %v1264_v7 = vmax.f32 %v1248_v0, 0.0 }
 0x34c   : > { %v1247_v6 = vadd.f32 %v2617_v59, %v1180_v4  ;;  %v1262_v9 = vmax.f32 %v1246_v3, 0.0 }
 0x34d   : > { %v1265_v8 = vmax.f32 %v1249_v5, 0.0 }
 0x34e   : > { %v1263_v10 = vmax.f32 %v1247_v6, 0.0  ;;  %v1758_v11 = vpop.f32.mrb[4].mxu1 }
 0x34f   : > { %v1617_v12 = vpack.c.bf16 %v1265_v8, %v1264_v7  ;;  %v1201_v13 = vadd.f32 %v1790_v46, %v1758_v11  ;;  %v999_v14 = vpop.f32.mrb[5].mxu1 }
 0x350   : > { %v1612_v15 = vpack.c.bf16 %v1263_v10, %v1262_v9  ;;  %v1193_v16 = vadd.f32 %v1192_v47, %v999_v14  ;;  %v1759_v17 = vpop.f32.mrb[6].mxu1 }
 0x351   : > { %1649 = vst [vmem:[%s2536_s14 + $0x8] sm:$0xff] %v1617_v12   ;;  %v1252_v18 = vadd.f32 %v2617_v59, %v1201_v13  ;;  %v1204_v19 = vadd.f32 %v1791_v48, %v1759_v17  ;;  %v1002_v20 = vpop.f32.mrb[7].mxu1 }
 0x352   : > { %1613 = vst [vmem:[%s2536_s14] sm:$0xff] %v1612_v15   ;;  %v1250_v21 = vadd.f32 %v2617_v59, %v1193_v16  ;;  %v1196_v22 = vadd.f32 %v1195_v49, %v1002_v20 }
 0x353   : > { %v1253_v23 = vadd.f32 %v2617_v59, %v1204_v19  ;;  %v1268_v25 = vmax.f32 %v1252_v18, 0.0 }
 0x354   : > { %v1251_v24 = vadd.f32 %v2617_v59, %v1196_v22  ;;  %v1266_v27 = vmax.f32 %v1250_v21, 0.0 }
 0x355   : > { %v1269_v26 = vmax.f32 %v1253_v23, 0.0 }
 0x356   : > { %v1267_v28 = vmax.f32 %v1251_v24, 0.0  ;;  %v1762_v29 = vpop.f32.mrb[8].mxu1 }
 0x357   : > { %v1627_v30 = vpack.c.bf16 %v1269_v26, %v1268_v25  ;;  %v1217_v31 = vadd.f32 %v1794_v50, %v1762_v29  ;;  %v1015_v32 = vpop.f32.mrb[9].mxu1 }
 0x358   : > { %v1622_v33 = vpack.c.bf16 %v1267_v28, %v1266_v27  ;;  %v1209_v34 = vadd.f32 %v1208_v51, %v1015_v32  ;;  %v1763_v35 = vpop.f32.mrb[10].mxu1 }
 0x359   : > { %1651 = vst [vmem:[%s2536_s14 + $0x18] sm:$0xff] %v1627_v30   ;;  %v1256_v36 = vadd.f32 %v2617_v59, %v1217_v31  ;;  %v1220_v37 = vadd.f32 %v1795_v52, %v1763_v35  ;;  %v1018_v38 = vpop.f32.mrb[11].mxu1 }
 0x35a   : > { %1650 = vst [vmem:[%s2536_s14 + $0x10] sm:$0xff] %v1622_v33   ;;  %v1254_v39 = vadd.f32 %v2617_v59, %v1209_v34  ;;  %v1212_v40 = vadd.f32 %v1211_v53, %v1018_v38 }
 0x35b   : > { %v1257_v41 = vadd.f32 %v2617_v59, %v1220_v37  ;;  %v1272_v43 = vmax.f32 %v1256_v36, 0.0 }
 0x35c   : > { %v1255_v42 = vadd.f32 %v2617_v59, %v1212_v40  ;;  %v1270_v45 = vmax.f32 %v1254_v39, 0.0 }
 0x35d   : > { %v1273_v44 = vmax.f32 %v1257_v41, 0.0 }
 0x35e   : > { %v1271_v46 = vmax.f32 %v1255_v42, 0.0  ;;  %v1766_v47 = vpop.f32.mrb[12].mxu1 }
 0x35f   : > { %v1637_v48 = vpack.c.bf16 %v1273_v44, %v1272_v43  ;;  %v1233_v49 = vadd.f32 %v2606_v54, %v1766_v47  ;;  %v1031_v50 = vpop.f32.mrb[13].mxu1 }
 0x360   : > { %v1632_v51 = vpack.c.bf16 %v1271_v46, %v1270_v45  ;;  %v1225_v52 = vadd.f32 %v2608_v55, %v1031_v50  ;;  %v1767_v58 = vpop.f32.mrb[14].mxu1 }
 0x361   : > { %1653 = vst [vmem:[%s2536_s14 + $0x28] sm:$0xff] %v1637_v48   ;;  %v1260_v53 = vadd.f32 %v2617_v59, %v1233_v49  ;;  %v1236_v60 = vadd.f32 %v2610_v56, %v1767_v58  ;;  %v1034_v61 = vpop.f32.mrb[15].mxu1 }
 0x362   : > { %1652 = vst [vmem:[%s2536_s14 + $0x20] sm:$0xff] %v1632_v51   ;;  %v1258_v62 = vadd.f32 %v2617_v59, %v1225_v52  ;;  %v1228_v63 = vadd.f32 %v2612_v57, %v1034_v61 }
 0x363   : > { %v1261_v54 = vadd.f32 %v2617_v59, %v1236_v60  ;;  %v1276_v1 = vmax.f32 %v1260_v53, 0.0 }
 0x364   : > { %v1259_v0 = vadd.f32 %v2617_v59, %v1228_v63  ;;  %v1274_v2 = vmax.f32 %v1258_v62, 0.0 }
 0x365   : > { %v1277_v55 = vmax.f32 %v1261_v54, 0.0 }
 0x366   : > { %v1275_v3 = vmax.f32 %v1259_v0, 0.0 }
 0x367   : > { %v1647_v4 = vpack.c.bf16 %v1277_v55, %v1276_v1 }
 0x368   : > { %v1642_v5 = vpack.c.bf16 %v1275_v3, %v1274_v2 }
 0x369   : > { %1655 = vst [vmem:[%s2536_s14 + $0x38] sm:$0xff] %v1647_v4  }
 0x36a   : > { %1654 = vst [vmem:[%s2536_s14 + $0x30] sm:$0xff] %v1642_v5  }
 0x36b PF: > { %s2776_s1 = sld [smem:[#allocation25_spill]]  ;;  %s1608_s8 = sshll.u32 %s2207_s23, 10 }
 0x36c   : > { %s2777_s27 = sld [smem:[#allocation31_spill]]  ;;  %s1372_s17 = sshll.u32 %s2536_s14, 4  ;;  %s2654_s17 = int_to_ptr.vmem [resolvable:$true] %s1372_s17 }
 0x36d   : > { %s2658_s6 = scalar_lea.sflag [#allocation9], %s400_s5  ;;  %s2095_s22 = scalar_lea.vmem %s2654_s17, 1024 }
 0x36e   : > { %p2096_p0 = scmp.ne.s32.totalorder %s2654_s17, %s2095_s22  ;;  %s2232_s23 = smov [#allocation13]  }
 0x36f   : > { %s2099_s30 = sshll.u32 %s2232_s23, 4  ;;  %s2100_s30 = int_to_ptr.vmem [resolvable:$false] %s2099_s30 }
 0x370   : > { %s2101_s15 = scalar_lea.vmem %s2100_s30, 2048  ;;  %p2102_p7 = scmp.lt.s32.totalorder %s2654_s17, %s2100_s30 }
 0x371   : > { %p2778_p2 = scmp.ne.s32.totalorder %s2776_s1, 0  ;;  %p2103_p12 = scmp.lt.s32.totalorder %s2101_s15, %s2095_s22 }
 0x372   : > { %s2651_s16 = scalar_lea.hbm %s2777_s27, %s1608_s8 }
 0x373   : > { %p2097_p4 = pnand %p2096_p0, %p2778_p2  ;;  %p2104_p13 = por %p2103_p12, %p2102_p7 }
 0x375   : > { %p2098_p8 = pneg %p2097_p4 }
 0x377   : > { %p2105_p9 = pnand %p2104_p13, %p2098_p8 }
 0x379   : > { %2108 = shalt.err (!%p2105_p9)
}
 0x37a   : > { %s2109_s5 = scalar_lea.hbm %s2651_s16, 1024  ;;  %s2113_s10 = scalar_lea.hbm %s2777_s27, 3072 }
 0x37b   : > { %p2110_p6 = scmp.ne.s32.totalorder %s2651_s16, %s2109_s5  ;;  %p2114_p1 = scmp.lt.u32.totalorder %s2651_s16, %s2777_s27 }
 0x37c   : > { %p2115_p3 = scmp.lt.u32.totalorder %s2113_s10, %s2109_s5  ;;  %p2117_p0 = scmp.lt.u32.totalorder %s2109_s5, %s2651_s16 }
 0x37d   : > { %p2111_p10 = pnand %p2110_p6, %p2778_p2 }
 0x37e   : > { %p2116_p5 = por %p2115_p3, %p2114_p1 }
 0x37f   : > { %p2112_p11 = pneg %p2111_p10 }
 0x380   : > { %p2118_p4 = por %p2117_p0, %p2116_p5 }
 0x382   : > { %p2119_p8 = pnand %p2118_p4, %p2112_p11 }
 0x384   : > { %2122 = shalt.err (!%p2119_p8)
}
 0x385   : > { %s2233_s29 = smov 64   ;;  %s2234_s12 = smov 4  }
 0x386   : > { %1843 = dma.vmem_to_hbm [thread:$0]  (%p2778_p2), %s2654_s17, 1024, %s2651_s16, %s2658_s6, %s2233_s29, %s2233_s29, %s2234_s12  }
 0x387 PF: > { %s2779_s20 = sld [smem:[#allocation19_spill]]  ;;  %s2780_s8 = sld [smem:[#allocation26_spill]] }
 0x388   : > { %p1860_p7 = scmp.ge.s32.totalorder %s2219_s26, 2 }
 0x38d   : > { %s1387_s13 = sand.u32 1, %s2779_s20   ;;  %p2781_p12 = scmp.ne.s32.totalorder %s2780_s8, 0 }
 0x38e   : > { %s1388_s9 = scalar_lea.sflag [#allocation9], %s1387_s13 }
 0x38f   : > { %p1853_p13 = pnand %p1860_p7, %p2781_p12 }
 0x391   : > { %2178 = dma.done.wait (!%p1853_p13), %s1388_s9, 1024  }
 0x392   : > { %2180 = vsyncadd (!%p1853_p13), %s1388_s9, 4294966272  ;;  %s36_s26 = sadd.s32 1, %s2219_s26   ;;  %s2782_s22 = sld [smem:[#allocation24_spill]] }
 0x393   : > { %p33_p9 = scmp.ge.s32.totalorder %s36_s26, 11   ;;  %s2783_s23 = sld [smem:[#allocation27_spill]] }
 0x394   : > { %s2784_s16 = sld [smem:[#allocation21_spill]]  ;;  %s2785_s24 = sld [smem:[#allocation22_spill]] }
 0x395   : > { %s2786_s17 = sld [smem:[#allocation23_spill]]  ;;  %s2787_s1 = smov %s2187_s18 }
 0x396   : > { %s2788_s18 = smov %s2191_s19  ;;  %s2790_s20 = smov %s2199_s21 }
 0x397   :  { %35 = sbr.rel (!%p33_p9) target bundleno = 36 (0x24), region = 164 }
 0x398   : > { %s2789_s19 = smov %s2782_s22 }
 0x399   : > { %s2791_s21 = smov %s2783_s23  ;;  %s2793_s23 = smov %s2215_s25 }
 0x39a   : > { %s2792_s22 = smov %s2784_s16 }
 0x39b   : > { %s2794_s25 = smov %s2786_s17 }
 0x39e   :  { %1393 = vsyncpa [#allocation8], 1 }
 0x39f   :  { %1395 = vsyncpa [#allocation8 + $0x1], 1 }
 0x3a0   :  { %1396 = vsyncpa [#allocation11], 1 }
 0x3a1   :  { %1398 = vsyncpa [#allocation11 + $0x1], 1 }
 0x3a2   :  { %1399 = vsyncpa [#allocation9], 1 }
 0x3a3   :  { %1401 = vsyncpa [#allocation9 + $0x1], 1 }

</bundles_post_ra>
